<compile_context>
chip_gen: v5e
topology: v5e:2x2
jax: 0.10.0
libtpu: 0.0.40
codegen_flags: <defaults>
</compile_context>

<pallas_src>
import jax
import jax.numpy as jnp
from jax.experimental import pallas as pl
from jax.experimental.pallas import tpu as pltpu


def _mxu_chunk_target():
    """Native MXU tile width: 128 on TPU v2-v5, 256 on v6e and newer (incl. v7x)."""
    try:
        kind = jax.devices()[0].device_kind.lower()
    except Exception:
        return 256
    return 128 if any(t in kind for t in ("v2", "v3", "v4", "v5")) else 256


def _pick_chunk(w, target):
    """Largest even divisor of W that is <= target, preferring lane-aligned (x128) widths."""
    if w <= target:
        return w
    cands = [c for c in range(2, target + 1, 2) if w % c == 0]
    aligned = [c for c in cands if c % 128 == 0]
    if aligned:
        return max(aligned)
    return max(cands) if cands else 2


def _pick_block_rows(n, rows, w, itemsize, pack, budget_bytes, min_steps=8):
    """Row-block size: largest multiple of the sublane pack fitting the VMEM budget.

    Real residency is ~2x(input + output) double-buffered and the output block has the same
    byte size as the input block, so the input block gets ~budget/4.  No divisibility
    requirement on `rows`: the grid uses cdiv and Pallas handles the ragged last block.
    """
    row_bytes = 2 * w * itemsize
    blk = max(pack, ((budget_bytes // 4) // row_bytes) // pack * pack)
    if blk >= rows:
        blk = rows                         # full-dim block is always layout-legal
    # Keep enough grid steps for v7x megacore sharding and double-buffer overlap.
    while n * ((rows + blk - 1) // blk) < min_steps and blk > pack:
        blk = max(pack, ((blk // 2) // pack) * pack)
    return blk


def make_haar_filter(wc, dtype):
    """Fused (Wc, Wc) chunk filter: cols [0, Wc/2) = pair-sum, cols [Wc/2, Wc) = pair-diff.

    Output column k combines input-column pair (2k, 2k+1) with +-0.5 weights (exact in
    bf16/f32): the W-direction Haar combine + downsample-by-2 as one small matmul RHS.
    """
    wc2 = wc // 2
    i = jnp.arange(wc)[:, None]            # input (chunk) column
    k = jnp.arange(wc2)[None, :]           # output (chunk) column
    pair = (i // 2) == k
    f_sum = jnp.where(pair, 0.5, 0.0)
    f_diff = jnp.where(pair, jnp.where(i % 2 == 0, 0.5, -0.5), 0.0)
    return jnp.concatenate([f_sum, f_diff], axis=1).astype(dtype)


def _haar_kernel(x_ref, f_ref, o_ref):
    # x_ref : (blk, 2W)    lanes [0, W) = even input rows, [W, 2W) = odd input rows.
    # f_ref : (Wc, Wc)     bf16 fused [pair-sum | pair-diff] chunk filter.
    # o_ref : (4, blk, W2) sub-bands in torch.cat order (ll, lh, hl, hh).
    blk = o_ref.shape[1]
    w = x_ref.shape[1] // 2
    wc = f_ref.shape[0]
    wc2 = wc // 2
    filt = f_ref[...]

    # Static (unrolled) loop over lane chunks of the native MXU width.
    for c in range(w // wc):
        cx, co = c * wc, c * wc2
        xe = x_ref[:, cx:cx + wc].astype(jnp.float32)           # even H row: a | b cols
        xo = x_ref[:, w + cx:w + cx + wc].astype(jnp.float32)   # odd  H row: c | d cols
        # H-direction Haar butterfly (VPU); stack along sublanes so ONE matmul per pass
        # produces all four sub-bands for this chunk.
        lhs = jnp.concatenate([xe + xo, xe - xo], axis=0)        # (2*blk, Wc) f32
        # Exact 3-way bf16 split of the LHS (the +-0.5 filter is bf16-exact): 3 plain bf16
        # MXU passes with f32-accurate results, instead of the ~6-pass HIGHEST path.
        hi = lhs.astype(jnp.bfloat16)
        rem = lhs - hi.astype(jnp.float32)
        mid = rem.astype(jnp.bfloat16)
        low = (rem - mid.astype(jnp.float32)).astype(jnp.bfloat16)
        r = (jnp.dot(hi, filt, preferred_element_type=jnp.float32)
             + jnp.dot(mid, filt, preferred_element_type=jnp.float32)
             + jnp.dot(low, filt, preferred_element_type=jnp.float32))   # (2*blk, Wc)
        # Rows [0, blk) carry (even+odd)-row terms, rows [blk, 2blk) carry (even-odd);
        # left lane half is the column pair-sum, right half the pair-diff.
        o_ref[0, :, co:co + wc2] = r[:blk, :wc2].astype(o_ref.dtype)   # ll = .5(a+b+c+d)
        o_ref[1, :, co:co + wc2] = r[blk:, :wc2].astype(o_ref.dtype)   # lh = .5(a+b-c-d)
        o_ref[2, :, co:co + wc2] = r[:blk, wc2:].astype(o_ref.dtype)   # hl = .5(a-b+c-d)
        o_ref[3, :, co:co + wc2] = r[blk:, wc2:].astype(o_ref.dtype)   # hh = .5(a-b-c+d)


def haar_transform(x, *, vmem_budget_bytes=16 * 1024 * 1024):
    """Pallas TPU implementation of HaarTransform.forward for NCHW input."""
    N, C, H, W = x.shape
    assert H % 2 == 0 and W % 2 == 0, "spatial dims must be even"
    H2, W2 = H // 2, W // 2
    rows = C * H2
    itemsize = jnp.dtype(x.dtype).itemsize
    pack = max(8, 32 // itemsize)          # sublane packing: 8 f32 / 16 bf16 / 32 int8

    # Free (order-preserving) reshape: row r=(c,h2) holds [x[n,c,2h2,:] | x[n,c,2h2+1,:]].
    xr = x.reshape(N, rows, 2 * W)

    # One tiny fused chunk filter (<= 128 KiB bf16) instead of dense (W, W/2) matrices.
    wc = _pick_chunk(W, _mxu_chunk_target())
    filt = make_haar_filter(wc, jnp.bfloat16)

    blk = _pick_block_rows(N, rows, W, itemsize, pack, vmem_budget_bytes)
    grid = (N, pl.cdiv(rows, blk))

    # 2x double-buffered (input + output) blocks + filter, plus headroom for in-kernel temps;
    # capped at 64 MiB so it stays within v7x physical VMEM.
    block_bytes = blk * 2 * W * itemsize   # input block == output block byte size
    need = 4 * block_bytes + 2 * wc * wc * 2
    vmem_limit = int(min(64 << 20, max(32 << 20, need + (8 << 20))))

    out = pl.pallas_call(
        _haar_kernel,
        out_shape=jax.ShapeDtypeStruct((N, 4, rows, W2), x.dtype),
        grid=grid,
        in_specs=[
            pl.BlockSpec((None, blk, 2 * W), lambda n, j: (n, j, 0)),  # streaming row block
            pl.BlockSpec((wc, wc), lambda n, j: (0, 0)),               # resident tiny filter
        ],
        out_specs=pl.BlockSpec((None, 4, blk, W2), lambda n, j: (n, 0, j, 0)),
        compiler_params=pltpu.CompilerParams(
            dimension_semantics=("parallel", "parallel"),
            vmem_limit_bytes=vmem_limit,
        ),
    )(xr, filt)

    # Free reshape: (N, 4, C*H2, W2) -> (N, 4C, H2, W2), channel = comp*C + c,
    # which is exactly torch.cat((ll, lh, hl, hh), dim=1).
    return out.reshape(N, 4 * C, H2, W2)


def haar_reference(x):
    """Plain-JAX reference of upfirdn2d(x, haar_k, down=2) + concat, for verification."""
    a = x[:, :, 0::2, 0::2]
    b = x[:, :, 0::2, 1::2]
    c = x[:, :, 1::2, 0::2]
    d = x[:, :, 1::2, 1::2]
    ll = 0.5 * (a + b + c + d)
    lh = 0.5 * (a + b - c - d)
    hl = 0.5 * (a - b + c - d)
    hh = 0.5 * (a - b - c + d)
    return jnp.concatenate([ll, lh, hl, hh], axis=1)


if __name__ == "__main__":
    key = jax.random.PRNGKey(0)
    x = jax.random.normal(key, (2, 4, 16, 16), dtype=jnp.float32)   # NCHW

    haar = jax.jit(haar_transform)
    out = jax.block_until_ready(haar(x))
    ref = jax.block_until_ready(haar_reference(x))

    assert out.shape == (2, 16, 8, 8), out.shape
    assert jnp.allclose(out, ref, atol=1e-4, rtol=1e-4), "mismatch vs reference"
    print("KERNEL_OK")
</pallas_src>

<mosaic_0001>
module attributes {stable_mosaic.version = 11 : i64} {
  func.func @_haar_kernel(%arg0: i32, %arg1: i32, %arg2: memref<1x8x32xf32, #tpu.memory_space<vmem>>, %arg3: memref<16x16xbf16, #tpu.memory_space<vmem>>, %arg4: memref<1x4x8x8xf32, #tpu.memory_space<vmem>>) attributes {dimension_semantics = [#tpu.dimension_semantics<parallel>, #tpu.dimension_semantics<parallel>], iteration_bounds = array<i64: 2, 4>, scalar_prefetch = 0 : i64, scratch_operands = 0 : i64, tpu.core_type = #tpu.core_type<tc>, window_params = [{transform_indices = @transform_0, window_bounds = array<i64: 1, 8, 32>}, {pipeline_mode = #tpu.pipeline_mode<synchronous>, transform_indices = @transform_1, window_bounds = array<i64: 16, 16>}, {transform_indices = @transform_2, window_bounds = array<i64: 1, 4, 8, 8>}]} {
    %c0 = arith.constant 0 : index
    %c0_0 = arith.constant 0 : index
    %0 = vector.load %arg3[%c0, %c0_0] : memref<16x16xbf16, #tpu.memory_space<vmem>>, vector<16x16xbf16>
    %c0_1 = arith.constant 0 : index
    %c0_2 = arith.constant 0 : index
    %c0_3 = arith.constant 0 : index
    %1 = vector.load %arg2[%c0_1, %c0_2, %c0_3] : memref<1x8x32xf32, #tpu.memory_space<vmem>>, vector<1x8x16xf32>
    %2 = vector.shape_cast %1 : vector<1x8x16xf32> to vector<8x16xf32>
    %c0_4 = arith.constant 0 : index
    %c0_5 = arith.constant 0 : index
    %c16 = arith.constant 16 : index
    %3 = vector.load %arg2[%c0_4, %c0_5, %c16] : memref<1x8x32xf32, #tpu.memory_space<vmem>>, vector<1x8x16xf32>
    %4 = vector.shape_cast %3 : vector<1x8x16xf32> to vector<8x16xf32>
    %5 = arith.addf %2, %4 : vector<8x16xf32>
    %6 = arith.subf %2, %4 : vector<8x16xf32>
    %7 = tpu.concatenate %5, %6 in 0 : vector<8x16xf32>, vector<8x16xf32> -> vector<16x16xf32>
    %8 = arith.truncf %7 : vector<16x16xf32> to vector<16x16xbf16>
    %9 = arith.extf %8 : vector<16x16xbf16> to vector<16x16xf32>
    %10 = arith.subf %7, %9 : vector<16x16xf32>
    %11 = arith.truncf %10 : vector<16x16xf32> to vector<16x16xbf16>
    %12 = arith.extf %11 : vector<16x16xbf16> to vector<16x16xf32>
    %13 = arith.subf %10, %12 : vector<16x16xf32>
    %14 = arith.truncf %13 : vector<16x16xf32> to vector<16x16xbf16>
    %cst = arith.constant dense<0.000000e+00> : vector<16x16xf32>
    %15 = tpu.matmul %8, %0, %cst {dimension_numbers = #tpu.dot_dimension_numbers<[1], [0], [0], [1], [0, 0, 1, 1], [], []>} : vector<16x16xbf16>, vector<16x16xbf16>, vector<16x16xf32> -> vector<16x16xf32>
    %cst_6 = arith.constant dense<0.000000e+00> : vector<16x16xf32>
    %16 = tpu.matmul %11, %0, %cst_6 {dimension_numbers = #tpu.dot_dimension_numbers<[1], [0], [0], [1], [0, 0, 1, 1], [], []>} : vector<16x16xbf16>, vector<16x16xbf16>, vector<16x16xf32> -> vector<16x16xf32>
    %17 = arith.addf %15, %16 : vector<16x16xf32>
    %cst_7 = arith.constant dense<0.000000e+00> : vector<16x16xf32>
    %18 = tpu.matmul %14, %0, %cst_7 {dimension_numbers = #tpu.dot_dimension_numbers<[1], [0], [0], [1], [0, 0, 1, 1], [], []>} : vector<16x16xbf16>, vector<16x16xbf16>, vector<16x16xf32> -> vector<16x16xf32>
    %19 = arith.addf %17, %18 : vector<16x16xf32>
    %20 = vector.extract_strided_slice %19 {offsets = [0, 0], sizes = [8, 8], strides = [1, 1]} : vector<16x16xf32> to vector<8x8xf32>
    %c0_8 = arith.constant 0 : index
    %c0_9 = arith.constant 0 : index
    %c0_10 = arith.constant 0 : index
    %c0_11 = arith.constant 0 : index
    %21 = vector.load %arg4[%c0_8, %c0_9, %c0_10, %c0_11] : memref<1x4x8x8xf32, #tpu.memory_space<vmem>>, vector<1x1x8x8xf32>
    %22 = vector.shape_cast %21 : vector<1x1x8x8xf32> to vector<8x8xf32>
    %23 = vector.shape_cast %20 : vector<8x8xf32> to vector<1x1x8x8xf32>
    tpu.vector_store %arg4[%c0_8, %c0_9, %c0_10, %c0_11], %23 {strides = array<i32>} : memref<1x4x8x8xf32, #tpu.memory_space<vmem>>, vector<1x1x8x8xf32>,
    %24 = vector.extract_strided_slice %19 {offsets = [8, 0], sizes = [8, 8], strides = [1, 1]} : vector<16x16xf32> to vector<8x8xf32>
    %c0_12 = arith.constant 0 : index
    %c1 = arith.constant 1 : index
    %c0_13 = arith.constant 0 : index
    %c0_14 = arith.constant 0 : index
    %25 = vector.load %arg4[%c0_12, %c1, %c0_13, %c0_14] : memref<1x4x8x8xf32, #tpu.memory_space<vmem>>, vector<1x1x8x8xf32>
    %26 = vector.shape_cast %25 : vector<1x1x8x8xf32> to vector<8x8xf32>
    %27 = vector.shape_cast %24 : vector<8x8xf32> to vector<1x1x8x8xf32>
    tpu.vector_store %arg4[%c0_12, %c1, %c0_13, %c0_14], %27 {strides = array<i32>} : memref<1x4x8x8xf32, #tpu.memory_space<vmem>>, vector<1x1x8x8xf32>,
    %28 = vector.extract_strided_slice %19 {offsets = [0, 8], sizes = [8, 8], strides = [1, 1]} : vector<16x16xf32> to vector<8x8xf32>
    %c0_15 = arith.constant 0 : index
    %c2 = arith.constant 2 : index
    %c0_16 = arith.constant 0 : index
    %c0_17 = arith.constant 0 : index
    %29 = vector.load %arg4[%c0_15, %c2, %c0_16, %c0_17] : memref<1x4x8x8xf32, #tpu.memory_space<vmem>>, vector<1x1x8x8xf32>
    %30 = vector.shape_cast %29 : vector<1x1x8x8xf32> to vector<8x8xf32>
    %31 = vector.shape_cast %28 : vector<8x8xf32> to vector<1x1x8x8xf32>
    tpu.vector_store %arg4[%c0_15, %c2, %c0_16, %c0_17], %31 {strides = array<i32>} : memref<1x4x8x8xf32, #tpu.memory_space<vmem>>, vector<1x1x8x8xf32>,
    %32 = vector.extract_strided_slice %19 {offsets = [8, 8], sizes = [8, 8], strides = [1, 1]} : vector<16x16xf32> to vector<8x8xf32>
    %c0_18 = arith.constant 0 : index
    %c3 = arith.constant 3 : index
    %c0_19 = arith.constant 0 : index
    %c0_20 = arith.constant 0 : index
    %33 = vector.load %arg4[%c0_18, %c3, %c0_19, %c0_20] : memref<1x4x8x8xf32, #tpu.memory_space<vmem>>, vector<1x1x8x8xf32>
    %34 = vector.shape_cast %33 : vector<1x1x8x8xf32> to vector<8x8xf32>
    %35 = vector.shape_cast %32 : vector<8x8xf32> to vector<1x1x8x8xf32>
    tpu.vector_store %arg4[%c0_18, %c3, %c0_19, %c0_20], %35 {strides = array<i32>} : memref<1x4x8x8xf32, #tpu.memory_space<vmem>>, vector<1x1x8x8xf32>,
    return
  }
  func.func @transform_0(%arg0: i32, %arg1: i32) -> (i32, i32, i32) {
    %c0_i32 = arith.constant 0 : i32
    %c0_i32_0 = arith.constant 0 : i32
    return %arg0, %arg1, %c0_i32 : i32, i32, i32
  }
  func.func @transform_1(%arg0: i32, %arg1: i32) -> (i32, i32) {
    %c0_i32 = arith.constant 0 : i32
    %c0_i32_0 = arith.constant 0 : i32
    %c0_i32_1 = arith.constant 0 : i32
    return %c0_i32, %c0_i32_0 : i32, i32
  }
  func.func @transform_2(%arg0: i32, %arg1: i32) -> (i32, i32, i32, i32) {
    %c0_i32 = arith.constant 0 : i32
    %c0_i32_0 = arith.constant 0 : i32
    %c0_i32_1 = arith.constant 0 : i32
    return %arg0, %c0_i32, %arg1, %c0_i32_0 : i32, i32, i32, i32
  }
}

</mosaic_0001>

<bundles_post_ra>
// kernel: haar_transform.1
= control target key start
LH: loop header
LB: loop body
LE: loop exit
PB: predicated region body
PF: predicated region fallthrough
CT: control target
= control target key end

     0   :  { %s553_s9 = smov 0   ;;  %s555_s10 = smov 0   ;;  %s658_s0 = inlined_call_operand.vmem [shape: f32[2,32,32], index: 0, kind: input, shape index: {}]   ;;  %s659_s1 = inlined_call_operand.vmem [shape: bf16[16,16], index: 1, kind: input, shape index: {}]   ;;  %s660_s2 = inlined_call_operand.vmem [shape: f32[2,4,32,8], index: 2, kind: output, shape index: {}]  }
   0x1   :  { %s557_s11 = smov 0   ;;  %s559_s12 = smov 0  }
   0x2   :  { %s561_s13 = smov 0   ;;  %s563_s14 = smov 0  }
   0x3   :  { %s565_s15 = smov 0  }
   0x4 LB: > { %s21_s16 = sadd.s32 1, %s526_s13  ;;  %s24_s17 = sadd.s32 1, %s530_s14  ;;  %s534_s15 = sphi %s565_s15, %s12_s15   ;;  %s530_s14 = sphi %s563_s14, %s667_s14   ;;  %s526_s13 = sphi %s561_s13, %s666_s13   ;;  %s522_s12 = sphi %s559_s12, %s665_s12   ;;  %s518_s11 = sphi %s557_s11, %s664_s11   ;;  %s514_s10 = sphi %s555_s10, %s663_s10   ;;  %s510_s9 = sphi %s553_s9, %s662_s9  }
   0x5   : > { %p22_p0 = scmp.ge.s32.totalorder %s21_s16, 4  ;;  %s398_s18 = sadd.s32 4294967295, %s534_s15  }
   0x6   : > { %p92_p1 = scmp.ne.s32.totalorder %s514_s10, %s510_s9  ;;  %p93_p2 = scmp.eq.s32.totalorder %s398_s18, 7 }
   0x7   : > { %s669_s16 = smov (%p22_p0, %s21_s16), 0  ;;  %s671_s17 = smov (!%p22_p0, %s24_s17), %s530_s14 }
   0x8   : > { %s78_s19 = ssub.s32 %s526_s13, %s669_s16  ;;  %p26_p3 = scmp.ge.s32.totalorder %s671_s17, 2 }
   0x9   : > { %p402_p4 = scmp.ge.s32.totalorder %s534_s15, 1  ;;  %p599_p5 = por %p93_p2, %p92_p1 }
   0xa   : > { %p131_p6 = scmp.lt.s32.totalorder %s534_s15, 9  ;;  %s673_s17 = smov (%p26_p3, %s671_s17), 0 }
   0xb   : > { %s77_s21 = ssub.s32 %s530_s14, %s673_s17  ;;  %s82_s23 = sadd.s32 1, %s514_s10 }
   0xc   : > { %p132_p7 = pnand %p402_p4, %p131_p6  ;;  %s79_s22 = sor.u32 %s78_s19, %s77_s21 }
   0xd   : > { %p80_p8 = scmp.eq.s32.totalorder %s79_s22, 0  ;;  %p155_p9 = scmp.lt.s32.totalorder (!%p132_p7), %s522_s12, 1 }
   0xe   : > { %135 = sbr.rel (%p132_p7) target bundleno = 423 (0x1a7), region = 28  ;;  %p157_p10 = scmp.lt.s32.totalorder (!%p132_p7), %s518_s11, 3 }
   0xf   : > { %s610_s24 = scalar_select %p80_p8, %s514_s10, %s82_s23  }
  0x10   : > { %s536_s5 = smov (!%p132_p7), 112   ;;  %s152_s8 = sand.u32 (!%p132_p7), 1, %s510_s9  }
  0x11   : > { %s403_s18 = sshll.u32 (!%p132_p7), %s152_s8, 5  ;;  %s537_s21 = smov (!%p132_p7), 120  }
  0x12   : > { %s154_s19 = scalar_lea.vmem (!%p132_p7), [#allocation2], %s403_s18 }
  0x13   : > { %s156_s25 = scalar_select %p155_p9, %s522_s12, 1  ;;  %v421_v1 = vld [vmem:[%s659_s1] sm:$0xff]  ;;  %vm197_vm0 = vcmask 130048   ;;  %vm256_vm1 = vcmask 64512  }
  0x14   : > { %s158_s26 = scalar_select %p157_p10, %s518_s11, 3  ;;  %230 = vmatpush.bf16.msra.mxu1 %v421_v1  ;;  %208 = vmatpush.bf16.msra.mxu0 %v421_v1 }
  0x15   : > { %s404_s27 = sshll.u32 %s156_s25, 2  ;;  %247 = vmatpush.bf16.msra.mxu2 %v421_v1  ;;  %s417_s9 = sshll.u32 (%p599_p5), %s522_s12, 4 }
  0x16   : > { %s160_s28 = sadd.s32 %s404_s27, %s158_s26  ;;  %s280_s22 = sadd.s32 (%p599_p5), %s518_s11, %s417_s9 }
  0x17   : > { %s405_s29 = sshll.u32 %s160_s28, 3  ;;  %s418_s23 = sshll.u32 (%p599_p5), %s280_s22, 3 }
  0x18   : > { %s162_s4 = scalar_lea.vmem %s658_s0, %s405_s29  ;;  %s282_s27 = scalar_lea.vmem (%p599_p5), %s660_s2, %s418_s23 }
  0x19   : > { %v166_v0 = vld [vmem:[%s162_s4] sm:$0xff] }
  0x1a   : > { %168 = vrot.lane.b32.xlu0 %v166_v0, %s536_s5 }
  0x8c   : > { %v169_v2 = vpop.permute.xlu0 %168 }
  0x8d   : > { %v171_v3 = vadd.f32 %v169_v2, %v166_v0  ;;  %v172_v4 = vsub.f32 %v166_v0, %v169_v2 }
  0x8f   : > { %v173_v5 = vpack.c.bf16 %v171_v3, %v171_v3  ;;  %v174_v6 = vpack.c.bf16 %v172_v4, %v172_v4 }
  0x91   : > { %v175_v7 = vunpack.c.l.bf16 %v173_v5  ;;  %v176_v8 = vunpack.c.l.bf16 %v174_v6  ;;  %v217_v9 = vunpack.c.l.b16 %v173_v5  ;;  %v218_v10 = vunpack.c.l.b16 %v174_v6 }
  0x93   : > { %v177_v11 = vsub.f32 %v171_v3, %v175_v7  ;;  %v178_v12 = vsub.f32 %v172_v4, %v176_v8  ;;  %v219_v13 = vpack.c.b16 %v218_v10, %v217_v9 }
  0x95   : > { %v179_v14 = vpack.c.bf16 %v177_v11, %v177_v11  ;;  %v180_v15 = vpack.c.bf16 %v178_v12, %v178_v12  ;;  %411 = vmatmul.msk.bf16.vlgmr.msra.gmra.mxu1 %vm197_vm0, %v219_v13 }
  0x97   : > { %v181_v16 = vunpack.c.l.bf16 %v179_v14  ;;  %v182_v17 = vunpack.c.l.bf16 %v180_v15  ;;  %v188_v18 = vunpack.c.l.b16 %v179_v14  ;;  %v189_v19 = vunpack.c.l.b16 %v180_v15 }
  0x99   : > { %v183_v20 = vsub.f32 %v177_v11, %v181_v16  ;;  %v184_v21 = vsub.f32 %v178_v12, %v182_v17  ;;  %v190_v22 = vpack.c.b16 %v189_v19, %v188_v18 }
  0x9b   : > { %410 = vmatmul.msk.bf16.vlgmr.msra.gmra.mxu0 %vm197_vm0, %v190_v22  ;;  %v185_v23 = vpack.c.bf16 %v184_v21, %v183_v20 }
  0x9d   : > { %412 = vmatmul.msk.bf16.vlgmr.msra.gmra.mxu2 %vm197_vm0, %v185_v23 }
 0x112   : > { %v232_v25 = vpop.f32.mrf.mxu1 }
 0x118   : > { %v210_v24 = vpop.f32.mrf.mxu0 }
 0x119   : > { %v233_v26 = vadd.f32 %v232_v25, %v210_v24 }
 0x11a   : > { %v234_v30 = vpop.f32.mrf.mxu1 }
 0x120   : > { %v249_v27 = vpop.f32.mrf.mxu2  ;;  %v212_v29 = vpop.f32.mrf.mxu0 }
 0x121   : > { %v254_v28 = vadd.f32 %v249_v27, %v233_v26  ;;  %v235_v31 = vadd.f32 %v234_v30, %v212_v29 }
 0x123   : > { %257 = vst.msk [vmem:[%s154_s19] sm:$0xff] %vm256_vm1, %v254_v28  ;;  %261 = vrot.lane.b32.xlu0 %v254_v28, %s537_s21 }
 0x128   : > { %v251_v32 = vpop.f32.mrf.mxu2 }
 0x129   : > { %v255_v33 = vadd.f32 %v251_v32, %v235_v31 }
 0x12a   : > { %v317_v36 = vld [vmem:[%s154_s19] sm:$0xff] (%p599_p5) }
 0x12b   : > { %413 = vst.msk [vmem:[%s154_s19 + $0x8] sm:$0xff] %vm256_vm1, %v255_v33  ;;  %267 = vrot.lane.b32.xlu1 %v255_v33, %s537_s21 }
 0x12c   : > { %318 = vst [vmem:[%s282_s27] sm:$0xff] (%p599_p5), %v317_v36 }
 0x132   : > { %v319_v37 = vld [vmem:[%s154_s19 + $0x8] sm:$0xff] (%p599_p5) }
 0x133   : > { %320 = vst [vmem:[%s282_s27 + $0x20] sm:$0xff] (%p599_p5), %v319_v37 }
 0x195   : > { %v262_v34 = vpop.permute.xlu0 %261 }
 0x196   : > { %414 = vst.msk [vmem:[%s154_s19 + $0x10] sm:$0xff] %vm256_vm1, %v262_v34 }
 0x19a   : > { %278 = sbr.rel (!%p599_p5) target bundleno = 423 (0x1a7), region = 32 }
 0x19d   : > { %v268_v35 = vpop.permute.xlu1 %267  ;;  %v321_v38 = vld [vmem:[%s154_s19 + $0x10] sm:$0xff] (%p599_p5) }
 0x19e   : > { %415 = vst.msk [vmem:[%s154_s19 + $0x18] sm:$0xff] %vm256_vm1, %v268_v35 }
 0x19f   : > { %322 = vst [vmem:[%s282_s27 + $0x40] sm:$0xff] %v321_v38 }
 0x1a5   : > { %v323_v39 = vld [vmem:[%s154_s19 + $0x18] sm:$0xff] }
 0x1a6   : > { %324 = vst [vmem:[%s282_s27 + $0x60] sm:$0xff] %v323_v39 }
 0x1a7 PF: > { %s12_s15 = sadd.s32 1, %s534_s15   ;;  %s662_s9 = smov %s514_s10 }
 0x1a8   : > { %p9_p11 = scmp.ge.s32.totalorder %s12_s15, 10   ;;  %s663_s10 = smov %s610_s24 }
 0x1a9   : > { %s664_s11 = smov %s526_s13  ;;  %s665_s12 = smov %s530_s14 }
 0x1aa   : > { %s666_s13 = smov %s669_s16  ;;  %s667_s14 = smov %s673_s17 }
 0x1ab   :  { %11 = sbr.rel (!%p9_p11) target bundleno = 4 (0x4), region = 99 }

</bundles_post_ra>
